<compile_context>
chip_gen: v7x
topology: tpu7x:2x2x1
jax: 0.10.0
libtpu: 0.0.40
codegen_flags: <defaults>
</compile_context>

<pallas_src>
import functools

import jax
import jax.numpy as jnp
from jax.experimental import pallas as pl
from jax.experimental.pallas import tpu as pltpu


# ----------------------------------------------------------------------------
# Pallas kernel: one deep-K matmul (MXU) + ReLU per (batch, P-tile) grid step
# ----------------------------------------------------------------------------
def _align_matmul_relu_kernel(col_ref, w_ref, o_ref):
    """Refs:
      col_ref: (1, TP, Mpad)       bf16  fused bilinear im2col tile
      w_ref  : (Mpad, Cout_pad)    bf16  conv weight (resident)
      o_ref  : (1, TP, Cout_pad)   f32   output block (lane-dense)
    """
    acc = jnp.dot(col_ref[0], w_ref[...], preferred_element_type=jnp.float32)
    o_ref[0] = jnp.maximum(acc, 0.0).astype(o_ref.dtype)


# ----------------------------------------------------------------------------
# Generation-aware VMEM budgeting and tile sizing
# ----------------------------------------------------------------------------
def _vmem_budget_and_limit():
    phys = 64 * 1024 * 1024                      # conservative default (v7x)
    try:
        phys = int(pltpu.get_tpu_info().vmem_capacity_bytes)
    except Exception:
        pass
    limit = min(int(phys * 0.80), 112 * 1024 * 1024)
    budget = min(int(phys * 0.45), 64 * 1024 * 1024)
    return budget, limit


def _choose_tile_p(P, Mpad, Cout_pad, n_batch, budget_bytes):
    """Largest P-tile that (a) fits the VMEM budget with correct accounting,
    (b) divides P, (c) prefers multiples of 256/128 (full MXU M-tiles,
    unmasked stores), (d) prefers leaving >= 4 grid steps (feeds 2 TCs)."""
    fixed = 2 * Mpad * Cout_pad * 2                      # resident weight (2 bufs)
    per_row = (2 * Mpad * 2                              # col bf16, double-buffered
               + 2 * Cout_pad * 4                        # out f32, double-buffered
               + Cout_pad * 4)                           # f32 matmul temporary
    cap = max(8, min(int((budget_bytes - fixed) // per_row), P, 2048))
    for want_steps in (True, False):
        for align in (256, 128, 64, 32, 16, 8):
            divs = [tp for tp in range(align, cap + 1, align) if P % tp == 0]
            if want_steps:
                divs = [tp for tp in divs if n_batch * (P // tp) >= 4]
            if divs:
                return max(divs)
    return P


def _matmul_relu_pallas(col, wmat, *, tile_p=None):
    """col: (N, P, Mpad) bf16, wmat: (Mpad, Cout_pad) bf16 -> (N, P, Cout_pad) f32."""
    N, P, Mpad = col.shape
    Cout_pad = wmat.shape[-1]
    budget, limit = _vmem_budget_and_limit()
    if tile_p is None:
        tile_p = _choose_tile_p(P, Mpad, Cout_pad, N, budget)
    assert P % tile_p == 0, (P, tile_p)
    grid = (N, P // tile_p)

    col_spec = pl.BlockSpec((1, tile_p, Mpad), lambda n, p: (n, p, 0))
    w_spec = pl.BlockSpec((Mpad, Cout_pad), lambda n, p: (0, 0))       # resident
    o_spec = pl.BlockSpec((1, tile_p, Cout_pad), lambda n, p: (n, p, 0))

    return pl.pallas_call(
        _align_matmul_relu_kernel,
        out_shape=jax.ShapeDtypeStruct((N, P, Cout_pad), jnp.float32),
        grid_spec=pltpu.PrefetchScalarGridSpec(
            num_scalar_prefetch=0,
            grid=grid,
            in_specs=[col_spec, w_spec],
            out_specs=o_spec,
        ),
        compiler_params=pltpu.CompilerParams(
            dimension_semantics=("parallel", "parallel"),
            vmem_limit_bytes=limit,
        ),
    )(col, wmat)


# ----------------------------------------------------------------------------
# get_offset: exact port of AlignConv.get_offset (plain JAX glue)
# ----------------------------------------------------------------------------
def get_offset(anchors, featmap_size, stride, kernel_size):
    feat_h, feat_w = featmap_size
    pad = (kernel_size - 1) // 2
    idx = jnp.arange(-pad, pad + 1, dtype=jnp.float32)
    yy, xx = jnp.meshgrid(idx, idx, indexing="ij")        # torch default 'ij'
    xx = xx.reshape(-1)
    yy = yy.reshape(-1)
    xc = jnp.arange(0, feat_w, dtype=jnp.float32)
    yc = jnp.arange(0, feat_h, dtype=jnp.float32)
    yc, xc = jnp.meshgrid(yc, xc, indexing="ij")
    xc = xc.reshape(-1)
    yc = yc.reshape(-1)
    x_conv = xc[:, None] + xx
    y_conv = yc[:, None] + yy

    x_ctr, y_ctr, w, h, a = (anchors[:, 0], anchors[:, 1], anchors[:, 2],
                             anchors[:, 3], anchors[:, 4])
    x_ctr, y_ctr, w, h = x_ctr / stride, y_ctr / stride, w / stride, h / stride
    cos, sin = jnp.cos(a), jnp.sin(a)
    dw, dh = w / kernel_size, h / kernel_size
    x, y = dw[:, None] * xx, dh[:, None] * yy
    xr = cos[:, None] * x - sin[:, None] * y
    yr = sin[:, None] * x + cos[:, None] * y
    x_anchor, y_anchor = xr + x_ctr[:, None], yr + y_ctr[:, None]
    offset_x = x_anchor - x_conv
    offset_y = y_anchor - y_conv
    offset = jnp.stack([offset_y, offset_x], axis=-1)       # (HW, KK, 2)
    offset = offset.reshape(anchors.shape[0], -1).transpose(1, 0)
    offset = offset.reshape(-1, feat_h, feat_w)             # (2*KK, H, W)
    return offset


# ----------------------------------------------------------------------------
# Wrapper glue: offsets + fused 4-corner gather & bilinear combine (XLA)
# ----------------------------------------------------------------------------
def _prepare_inputs(x, anchors, stride, weight, kernel_size):
    N, Cin, H, W = x.shape
    K = kernel_size
    KK = K * K
    pad = (K - 1) // 2
    P = H * W
    Cout = weight.shape[0]

    # offsets, vmapped over the batch (no python per-image loop)
    offset = jax.vmap(
        lambda a: get_offset(a.reshape(-1, 5), (H, W), stride, K))(anchors)
    off_y = offset[:, 0::2]                                  # (N, KK, H, W)
    off_x = offset[:, 1::2]

    # deformable sampling locations (stride=1, dilation=1)
    kidx = jnp.arange(-pad, pad + 1, dtype=jnp.float32)
    yy, xx = jnp.meshgrid(kidx, kidx, indexing="ij")
    yy = yy.reshape(-1)
    xx = xx.reshape(-1)
    hgrid = jnp.arange(H, dtype=jnp.float32)
    wgrid = jnp.arange(W, dtype=jnp.float32)
    base_y = hgrid[None, :, None] + yy[:, None, None]        # (KK, H, 1)
    base_x = wgrid[None, None, :] + xx[:, None, None]        # (KK, 1, W)
    h_im = (base_y[None] + off_y).reshape(N, KK, P).transpose(0, 2, 1)  # (N,P,KK)
    w_im = (base_x[None] + off_x).reshape(N, KK, P).transpose(0, 2, 1)

    # mmcv bilinear bookkeeping; per-corner validity folded into the weights
    valid = (h_im > -1.0) & (h_im < H) & (w_im > -1.0) & (w_im < W)
    h_low = jnp.floor(h_im)
    w_low = jnp.floor(w_im)
    lh = h_im - h_low
    lw = w_im - w_low
    hh = 1.0 - lh
    hw = 1.0 - lw
    h_lo = h_low.astype(jnp.int32)
    w_lo = w_low.astype(jnp.int32)
    h_hi = h_lo + 1
    w_hi = w_lo + 1
    m1 = (valid & (h_lo >= 0) & (w_lo >= 0)).astype(jnp.float32)
    m2 = (valid & (h_lo >= 0) & (w_hi <= W - 1)).astype(jnp.float32)
    m3 = (valid & (h_hi <= H - 1) & (w_lo >= 0)).astype(jnp.float32)
    m4 = (valid & (h_hi <= H - 1) & (w_hi <= W - 1)).astype(jnp.float32)

    # fused corner gather + bilinear combine (stays in XLA; data-dependent
    # gather has no rectangular BlockSpec form). Combine kept in f32, cast to
    # bf16 once, so numerics match the f32-combine path of the prior version.
    xpc = x.reshape(N, Cin, P).transpose(0, 2, 1)            # (N, P, Cin)

    def corner(hc, wc):
        idx = jnp.clip(hc, 0, H - 1) * W + jnp.clip(wc, 0, W - 1)   # (N,P,KK)
        return jax.vmap(lambda xn, idn: xn[idn])(xpc, idx)          # (N,P,KK,Cin)

    col = ((hh * hw * m1)[..., None] * corner(h_lo, w_lo)
           + (hh * lw * m2)[..., None] * corner(h_lo, w_hi)
           + (lh * hw * m3)[..., None] * corner(h_hi, w_lo)
           + (lh * lw * m4)[..., None] * corner(h_hi, w_hi))        # (N,P,KK,Cin) f32

    M = KK * Cin
    Mpad = ((M + 127) // 128) * 128
    Cout_pad = ((Cout + 127) // 128) * 128

    col = col.astype(jnp.bfloat16).reshape(N, P, M)          # bf16 on the wire
    if Mpad != M:
        col = jnp.pad(col, ((0, 0), (0, 0), (0, Mpad - M)))

    # weight (Cout, Cin, K, K) -> (KK*Cin, Cout_pad), tap-major (matches col)
    wmat = jnp.transpose(weight, (2, 3, 1, 0)).reshape(M, Cout)
    wmat = jnp.pad(wmat, ((0, Mpad - M), (0, Cout_pad - Cout))).astype(jnp.bfloat16)
    return col, wmat, (N, H, W, Cout)


# ----------------------------------------------------------------------------
# AlignConv forward (Pallas) and an independently-ordered pure-JAX reference
# ----------------------------------------------------------------------------
def align_conv_forward(x, anchors, stride, weight, kernel_size=3, tile_p=None):
    """x: (N, Cin, H, W); anchors: (N, H, W, 5); weight: (Cout, Cin, K, K)."""
    col, wmat, (N, H, W, Cout) = _prepare_inputs(x, anchors, stride, weight,
                                                 kernel_size)
    out = _matmul_relu_pallas(col, wmat, tile_p=tile_p)      # (N, P, Cout_pad) f32
    out = out[..., :Cout]
    # NCHW to match the PyTorch module (emit NHWC instead if downstream allows).
    return out.reshape(N, H, W, Cout).transpose(0, 3, 1, 2)


def align_conv_forward_ref(x, anchors, stride, weight, kernel_size=3):
    """Pure-JAX reference: independent gather/bilinear/contraction ordering,
    mirroring only the kernel's dtype path (f32 combine -> bf16 -> f32 matmul)."""
    N, Cin, H, W = x.shape
    K = kernel_size
    KK = K * K
    pad = (K - 1) // 2
    P = H * W
    Cout = weight.shape[0]

    offset = jax.vmap(
        lambda a: get_offset(a.reshape(-1, 5), (H, W), stride, K))(anchors)
    off_y = offset[:, 0::2]                                  # (N, KK, H, W)
    off_x = offset[:, 1::2]

    kidx = jnp.arange(-pad, pad + 1, dtype=jnp.float32)
    yy, xx = jnp.meshgrid(kidx, kidx, indexing="ij")
    yy = yy.reshape(-1)
    xx = xx.reshape(-1)
    hgrid = jnp.arange(H, dtype=jnp.float32)
    wgrid = jnp.arange(W, dtype=jnp.float32)
    base_y = hgrid[None, :, None] + yy[:, None, None]
    base_x = wgrid[None, None, :] + xx[:, None, None]
    h_im = (base_y[None] + off_y).reshape(N, KK, P)          # (N, KK, P)
    w_im = (base_x[None] + off_x).reshape(N, KK, P)

    valid = (h_im > -1.0) & (h_im < H) & (w_im > -1.0) & (w_im < W)
    h_lo = jnp.floor(h_im).astype(jnp.int32)
    w_lo = jnp.floor(w_im).astype(jnp.int32)
    h_hi = h_lo + 1
    w_hi = w_lo + 1
    lh = h_im - h_lo
    lw = w_im - w_lo
    hh = 1.0 - lh
    hw = 1.0 - lw

    xf = x.reshape(N, Cin, P)

    def sample(hc, wc):
        ok = (hc >= 0) & (hc <= H - 1) & (wc >= 0) & (wc <= W - 1)
        idx = jnp.clip(hc, 0, H - 1) * W + jnp.clip(wc, 0, W - 1)   # (N,KK,P)
        v = jax.vmap(lambda xn, idn: xn[:, idn])(xf, idx)           # (N,Cin,KK,P)
        return jnp.where(ok[:, None], v, 0.0)

    col = ((hh * hw)[:, None] * sample(h_lo, w_lo)
           + (hh * lw)[:, None] * sample(h_lo, w_hi)
           + (lh * hw)[:, None] * sample(h_hi, w_lo)
           + (lh * lw)[:, None] * sample(h_hi, w_hi))        # (N,Cin,KK,P) f32
    col = jnp.where(valid[:, None], col, 0.0)

    out = jnp.einsum("ock,nckp->nop",
                     weight.reshape(Cout, Cin, KK).astype(jnp.bfloat16),
                     col.astype(jnp.bfloat16),
                     preferred_element_type=jnp.float32)
    out = jnp.maximum(out, 0.0)
    return out.reshape(N, Cout, H, W)


# ----------------------------------------------------------------------------
if __name__ == "__main__":
    key = jax.random.PRNGKey(0)
    N, Cin, H, W = 2, 4, 16, 16
    Cout, K = 8, 3
    stride = 8.0

    k_x, k_w, k_wh, k_a = jax.random.split(key, 4)
    x = jax.random.normal(k_x, (N, Cin, H, W), dtype=jnp.float32)

    # DeformConv2d weight, normal_init std=0.01, no bias (mmcv DeformConv2d)
    weight = 0.01 * jax.random.normal(k_w, (Cout, Cin, K, K), dtype=jnp.float32)

    # Rotated anchors (x_ctr, y_ctr, w, h, angle), one per feature location.
    ys, xs = jnp.meshgrid(jnp.arange(H, dtype=jnp.float32),
                          jnp.arange(W, dtype=jnp.float32), indexing="ij")
    x_ctr = (xs + 0.5) * stride
    y_ctr = (ys + 0.5) * stride
    wh = stride * (1.0 + jax.random.uniform(k_wh, (N, H, W, 2)) * 3.0)
    ang = (jax.random.uniform(k_a, (N, H, W)) - 0.5) * (jnp.pi / 2)
    anchors = jnp.stack(
        [jnp.broadcast_to(x_ctr, (N, H, W)),
         jnp.broadcast_to(y_ctr, (N, H, W)),
         wh[..., 0], wh[..., 1], ang], axis=-1)              # (N, H, W, 5)

    # tile_p=None exercises the generation-aware auto-sizer (picks 128 here,
    # giving a (2, 2) grid at P = 256).
    fwd = jax.jit(functools.partial(align_conv_forward, kernel_size=K,
                                    tile_p=None))
    out = jax.block_until_ready(fwd(x, anchors, stride, weight))
    assert out.shape == (N, Cout, H, W), out.shape

    ref_fwd = jax.jit(functools.partial(align_conv_forward_ref, kernel_size=K))
    ref = jax.block_until_ready(ref_fwd(x, anchors, stride, weight))
    max_err = float(jnp.max(jnp.abs(out - ref)))
    assert jnp.allclose(out, ref, atol=2e-4, rtol=1e-3), max_err

    print("KERNEL_OK")
</pallas_src>

<mosaic_0001>
module attributes {stable_mosaic.version = 11 : i64} {
  func.func @_align_matmul_relu_kernel(%arg0: i32, %arg1: i32, %arg2: memref<1x128x128xbf16, #tpu.memory_space<vmem>>, %arg3: memref<128x128xbf16, #tpu.memory_space<vmem>>, %arg4: memref<1x128x128xf32, #tpu.memory_space<vmem>>) attributes {dimension_semantics = [#tpu.dimension_semantics<parallel>, #tpu.dimension_semantics<parallel>], iteration_bounds = array<i64: 2, 2>, scalar_prefetch = 0 : i64, scratch_operands = 0 : i64, tpu.core_type = #tpu.core_type<tc>, window_params = [{transform_indices = @transform_0, window_bounds = array<i64: 1, 128, 128>}, {pipeline_mode = #tpu.pipeline_mode<synchronous>, transform_indices = @transform_1, window_bounds = array<i64: 128, 128>}, {transform_indices = @transform_2, window_bounds = array<i64: 1, 128, 128>}]} {
    %c0 = arith.constant 0 : index
    %c0_0 = arith.constant 0 : index
    %c0_1 = arith.constant 0 : index
    %0 = vector.load %arg2[%c0, %c0_0, %c0_1] : memref<1x128x128xbf16, #tpu.memory_space<vmem>>, vector<1x128x128xbf16>
    %1 = vector.shape_cast %0 : vector<1x128x128xbf16> to vector<128x128xbf16>
    %c0_2 = arith.constant 0 : index
    %c0_3 = arith.constant 0 : index
    %2 = vector.load %arg3[%c0_2, %c0_3] : memref<128x128xbf16, #tpu.memory_space<vmem>>, vector<128x128xbf16>
    %cst = arith.constant dense<0.000000e+00> : vector<128x128xf32>
    %3 = tpu.matmul %1, %2, %cst {dimension_numbers = #tpu.dot_dimension_numbers<[1], [0], [0], [1], [0, 0, 1, 1], [], []>} : vector<128x128xbf16>, vector<128x128xbf16>, vector<128x128xf32> -> vector<128x128xf32>
    %cst_4 = arith.constant 0.000000e+00 : f32
    %4 = vector.broadcast %cst_4 : f32 to vector<128x128xf32>
    %5 = arith.maximumf %3, %4 : vector<128x128xf32>
    %c0_5 = arith.constant 0 : index
    %c0_6 = arith.constant 0 : index
    %c0_7 = arith.constant 0 : index
    %6 = vector.load %arg4[%c0_5, %c0_6, %c0_7] : memref<1x128x128xf32, #tpu.memory_space<vmem>>, vector<1x128x128xf32>
    %7 = vector.shape_cast %6 : vector<1x128x128xf32> to vector<128x128xf32>
    %8 = vector.shape_cast %5 : vector<128x128xf32> to vector<1x128x128xf32>
    tpu.vector_store %arg4[%c0_5, %c0_6, %c0_7], %8 {strides = array<i32>} : memref<1x128x128xf32, #tpu.memory_space<vmem>>, vector<1x128x128xf32>,
    return
  }
  func.func @transform_0(%arg0: i32, %arg1: i32) -> (i32, i32, i32) {
    %c0_i32 = arith.constant 0 : i32
    %c0_i32_0 = arith.constant 0 : i32
    return %arg0, %arg1, %c0_i32 : i32, i32, i32
  }
  func.func @transform_1(%arg0: i32, %arg1: i32) -> (i32, i32) {
    %c0_i32 = arith.constant 0 : i32
    %c0_i32_0 = arith.constant 0 : i32
    %c0_i32_1 = arith.constant 0 : i32
    return %c0_i32, %c0_i32_0 : i32, i32
  }
  func.func @transform_2(%arg0: i32, %arg1: i32) -> (i32, i32, i32) {
    %c0_i32 = arith.constant 0 : i32
    %c0_i32_0 = arith.constant 0 : i32
    return %arg0, %arg1, %c0_i32 : i32, i32, i32
  }
}

</mosaic_0001>

<bundles_post_ra>
// kernel: mul.62
= control target key start
LH: loop header
LB: loop body
LE: loop exit
PB: predicated region body
PF: predicated region fallthrough
CT: control target
= control target key end

     0   :  { %vm7_vm0 = vcmask 23552   ;;  %s30_s8 = smov 3   ;;  %vm13_vm1 = vcmask 72752   ;;  %vm19_vm2 = vcmask 48152   ;;  %s47_s0 = inlined_call_operand.vmem [shape: f32[3,3], index: 0, kind: input, shape index: {}]   ;;  %s48_s1 = inlined_call_operand.vmem [shape: f32[9], index: 1, kind: output, shape index: {}]  }
   0x1   :  { %v4_v0 = vld [vmem:[%s47_s0] sm:$0xf]  ;;  %s29_s0 = smov 6  }
   0x2   :  { %5 = vst [vmem:[#allocation1] sm:$0xf] %v4_v0 }
   0x9   :  { %v10_v1 = vld [vmem:[#allocation1 + $0x2] sm:$0x1]   ;;  %v6_v2 = vld [vmem:[#allocation1] sm:$0x1]   ;;  %v16_v3 = vld [vmem:[#allocation1 + $0x1] sm:$0x1]  }
   0xa   :  { %11 = vrot.lane.b32.xlu0 %v10_v1, %s29_s0  ;;  %8 = vst.msk [vmem:[#allocation0] sm:$0x1] %vm7_vm0, %v6_v2  }
   0xe   :  { %17 = vrot.lane.b32.xlu0 %v16_v3, %s30_s8 }
  0x7c   :  { %v12_v4 = vpop.permute.xlu0 %11  }
  0x7d   :  { %14 = vst.msk [vmem:[#allocation0] sm:$0x1] %vm13_vm1, %v12_v4  }
  0x80   :  { %v18_v5 = vpop.permute.xlu0 %17  }
  0x81   :  { %20 = vst.msk [vmem:[#allocation0] sm:$0x1] %vm19_vm2, %v18_v5  }
  0x88   :  { %v24_v6 = vld [vmem:[#allocation0] sm:$0x1] }
  0x89   :  { %26 = vst [vmem:[%s48_s1] sm:$0x1] %v24_v6 }

// kernel: align_conv_forward.1
= control target key start
LH: loop header
LB: loop body
LE: loop exit
PB: predicated region body
PF: predicated region fallthrough
CT: control target
= control target key end

     0   :  { %s735_s9 = smov 0   ;;  %s737_s10 = smov 0   ;;  %s845_s0 = inlined_call_operand.vmem [shape: bf16[2,256,128], index: 0, kind: input, shape index: {}]   ;;  %s846_s1 = inlined_call_operand.vmem [shape: bf16[128,128], index: 1, kind: input, shape index: {}]   ;;  %s847_s2 = inlined_call_operand.vmem [shape: f32[2,256,128], index: 2, kind: output, shape index: {}]  }
   0x1   :  { %s739_s11 = smov 0   ;;  %s741_s12 = smov 0  }
   0x2   :  { %s743_s13 = smov 0  }
   0x3 LB: > { %s21_s14 = sadd.s32 1, %s710_s11  ;;  %s24_s15 = sadd.s32 1, %s714_s12  ;;  %s718_s13 = sphi %s743_s13, %s12_s13   ;;  %s714_s12 = sphi %s741_s12, %s851_s12   ;;  %s710_s11 = sphi %s739_s11, %s850_s11   ;;  %s706_s10 = sphi %s737_s10, %s849_s10   ;;  %s702_s9 = sphi %s735_s9, %s848_s9  }
   0x4   : > { %p22_p0 = scmp.ge.s32.totalorder %s21_s14, 2  ;;  %p535_p1 = scmp.ge.s32.totalorder %s718_s13, 1 }
   0x5   : > { %p133_p2 = scmp.lt.s32.totalorder %s718_s13, 5 }
   0x6   : > { %s853_s14 = smov (%p22_p0, %s21_s14), 0  ;;  %s855_s15 = smov (!%p22_p0, %s24_s15), %s714_s12 }
   0x7   : > { %p134_p3 = pnand %p535_p1, %p133_p2  ;;  %p26_p4 = scmp.ge.s32.totalorder %s855_s15, 2 }
   0x8   : > { %v664_v0 = vld [vmem:[%s846_s1] sm:$0xff] (!%p134_p3)   ;;  %s536_s18 = sshll.u32 (!%p134_p3), %s702_s9, 4  ;;  %v665_v1 = vld [vmem:[%s846_s1 + $0x8] sm:$0xff] (!%p134_p3)   ;;  %p164_p5 = scmp.lt.s32.totalorder (!%p134_p3), %s706_s10, 1  ;;  %v666_v2 = vld [vmem:[%s846_s1 + $0x10] sm:$0xff] (!%p134_p3)  }
   0x9   : > { %s857_s15 = smov (%p26_p4, %s855_s15), 0  ;;  %137 = sbr.rel (%p134_p3) target bundleno = 269 (0x10d), region = 28 }
   0xa   : > { %576 = vmatprep.subr.bf16.mxu0 (!%p134_p3), %v664_v0  ;;  %608 = vmatprep.subr.bf16.mxu1 (!%p134_p3), %v664_v0  ;;  %p166_p6 = scmp.lt.s32.totalorder (!%p134_p3), %s536_s18, 31  ;;  %v667_v3 = vld [vmem:[%s846_s1 + $0x18] sm:$0xff] (!%p134_p3)   ;;  %v668_v6 = vld [vmem:[%s846_s1 + $0x20] sm:$0xff] (!%p134_p3)   ;;  %v669_v7 = vld [vmem:[%s846_s1 + $0x28] sm:$0xff] (!%p134_p3)  }
   0xb   : > { %577 = vmatpush3.bf16.msra.mxu0 (!%p134_p3), %v664_v0  ;;  %616 = vmatpush3.bf16.msra.mxu1 (!%p134_p3), %v664_v0  ;;  %v670_v8 = vld [vmem:[%s846_s1 + $0x30] sm:$0xff] (!%p134_p3)   ;;  %v671_v9 = vld [vmem:[%s846_s1 + $0x38] sm:$0xff] (!%p134_p3)  }
   0xc   : > { %578 = vmatprep.subr.bf16.mxu0 (!%p134_p3), %v665_v1  ;;  %609 = vmatprep.subr.bf16.mxu1 (!%p134_p3), %v665_v1 }
   0xf   : > { %579 = vmatpush3.bf16.msra.mxu0 (!%p134_p3), %v665_v1  ;;  %617 = vmatpush3.bf16.msra.mxu1 (!%p134_p3), %v665_v1 }
  0x10   : > { %s859_s10 = smov (!%p164_p5, %s706_s10), 1  ;;  %s861_s18 = smov (!%p166_p6, %s536_s18), 31  ;;  %580 = vmatprep.subr.bf16.mxu0 %v666_v2  ;;  %610 = vmatprep.subr.bf16.mxu1 %v666_v2 }
  0x11   : > { %s537_s23 = sshll.u32 %s859_s10, 5 }
  0x12   : > { %s777_s24 = sadd.s32 %s537_s23, %s861_s18 }
  0x13   : > { %s538_s25 = sshll.u32 %s777_s24, 2  ;;  %581 = vmatpush3.bf16.msra.mxu0 %v666_v2  ;;  %618 = vmatpush3.bf16.msra.mxu1 %v666_v2  ;;  %s541_s16 = sshll.u32 %s777_s24, 3 }
  0x14   : > { %s786_s30 = scalar_lea.vmem %s845_s0, %s538_s25  ;;  %582 = vmatprep.subr.bf16.mxu0 %v667_v3  ;;  %611 = vmatprep.subr.bf16.mxu1 %v667_v3  ;;  %s812_s19 = scalar_lea.vmem %s847_s2, %s541_s16 }
  0x15   : > { %v672_v4 = vld [vmem:[%s786_s30] sm:$0xff]   ;;  %v674_v10 = vld [vmem:[%s786_s30 + $0x8] sm:$0xff]   ;;  %v676_v12 = vld [vmem:[%s786_s30 + $0x10] sm:$0xff]  }
  0x16   : > { %v673_v5 = vld [vmem:[%s786_s30 + $0x20] sm:$0xff]   ;;  %592 = vmatprep.mubr.bf16.mxu0 %v672_v4  ;;  %v675_v11 = vld [vmem:[%s786_s30 + $0x28] sm:$0xff]   ;;  %v677_v13 = vld [vmem:[%s786_s30 + $0x30] sm:$0xff]  }
  0x17   : > { %600 = vmatprep.mubr.bf16.mxu1 %v673_v5  ;;  %583 = vmatpush3.bf16.msra.mxu0 %v667_v3  ;;  %v678_v14 = vld [vmem:[%s786_s30 + $0x18] sm:$0xff]  }
  0x18   : > { %619 = vmatpush3.bf16.msra.mxu1 %v667_v3  ;;  %584 = vmatprep.subr.bf16.mxu0 %v668_v6  ;;  %v679_v15 = vld [vmem:[%s786_s30 + $0x38] sm:$0xff]  }
  0x19   : > { %612 = vmatprep.subr.bf16.mxu1 %v668_v6 }
  0x1b   : > { %585 = vmatpush3.bf16.msra.mxu0 %v668_v6 }
  0x1c   : > { %620 = vmatpush3.bf16.msra.mxu1 %v668_v6  ;;  %586 = vmatprep.subr.bf16.mxu0 %v669_v7 }
  0x1d   : > { %613 = vmatprep.subr.bf16.mxu1 %v669_v7 }
  0x1f   : > { %587 = vmatpush3.bf16.msra.mxu0 %v669_v7 }
  0x20   : > { %621 = vmatpush3.bf16.msra.mxu1 %v669_v7  ;;  %588 = vmatprep.subr.bf16.mxu0 %v670_v8 }
  0x21   : > { %614 = vmatprep.subr.bf16.mxu1 %v670_v8 }
  0x23   : > { %589 = vmatpush3.bf16.msra.mxu0 %v670_v8 }
  0x24   : > { %622 = vmatpush3.bf16.msra.mxu1 %v670_v8  ;;  %590 = vmatprep.subr.bf16.mxu0 %v671_v9 }
  0x25   : > { %615 = vmatprep.subr.bf16.mxu1 %v671_v9 }
  0x27   : > { %591 = vmatpush3.bf16.msra.mxu0 %v671_v9 }
  0x28   : > { %623 = vmatpush3.bf16.msra.mxu1 %v671_v9 }
  0x2a   : > { %593 = vmatmul.mubr.bf16.vlgmr.msra.gmra.mrb[0].mxu0 %v674_v10 }
  0x2b   : > { %601 = vmatmul.mubr.bf16.vlgmr.msra.gmra.mrb[0].mxu1 %v675_v11  ;;  %596 = vmatprep.mubr.bf16.mxu0 %v676_v12 }
  0x2c   : > { %604 = vmatprep.mubr.bf16.mxu1 %v677_v13 }
  0x32   : > { %597 = vmatmul.mubr.bf16.gmra.mrb[4].mxu0 %v678_v14 }
  0x33   : > { %605 = vmatmul.mubr.bf16.gmra.mrb[4].mxu1 %v679_v15 }
  0xfd   : > { %v594_v16 = vpop.f32.mrb[0].mxu0 }
  0xfe   : > { %v602_v17 = vpop.f32.mrb[0].mxu1  ;;  %v411_v18 = vmax.f32 %v594_v16, 0.0  ;;  %v346_v20 = vpop.f32.mrb[1].mxu0 }
  0xff   : > { %v419_v19 = vmax.f32 %v602_v17, 0.0  ;;  %v378_v21 = vpop.f32.mrb[1].mxu1  ;;  %v409_v22 = vmax.f32 %v346_v20, 0.0  ;;  %v595_v24 = vpop.f32.mrb[2].mxu0 }
 0x100   : > { %v417_v23 = vmax.f32 %v378_v21, 0.0  ;;  %v603_v25 = vpop.f32.mrb[2].mxu1  ;;  %427 = vst [vmem:[%s812_s19 + $0x10] sm:$0xff] %v411_v18  ;;  %v412_v26 = vmax.f32 %v595_v24, 0.0  ;;  %v349_v28 = vpop.f32.mrb[3].mxu0 }
 0x101   : > { %435 = vst [vmem:[%s812_s19 + $0x50] sm:$0xff] %v419_v19  ;;  %v420_v27 = vmax.f32 %v603_v25, 0.0  ;;  %v381_v29 = vpop.f32.mrb[3].mxu1  ;;  %425 = vst [vmem:[%s812_s19] sm:$0xff] %v409_v22  ;;  %v410_v30 = vmax.f32 %v349_v28, 0.0 }
 0x102   : > { %433 = vst [vmem:[%s812_s19 + $0x40] sm:$0xff] %v417_v23  ;;  %v418_v31 = vmax.f32 %v381_v29, 0.0  ;;  %428 = vst [vmem:[%s812_s19 + $0x18] sm:$0xff] %v412_v26 }
 0x103   : > { %436 = vst [vmem:[%s812_s19 + $0x58] sm:$0xff] %v420_v27  ;;  %426 = vst [vmem:[%s812_s19 + $0x8] sm:$0xff] %v410_v30 }
 0x104   : > { %434 = vst [vmem:[%s812_s19 + $0x48] sm:$0xff] %v418_v31 }
 0x105   : > { %v598_v32 = vpop.f32.mrb[4].mxu0 }
 0x106   : > { %v606_v33 = vpop.f32.mrb[4].mxu1  ;;  %v415_v34 = vmax.f32 %v598_v32, 0.0  ;;  %v362_v36 = vpop.f32.mrb[5].mxu0 }
 0x107   : > { %v423_v35 = vmax.f32 %v606_v33, 0.0  ;;  %v394_v37 = vpop.f32.mrb[5].mxu1  ;;  %v413_v38 = vmax.f32 %v362_v36, 0.0  ;;  %v599_v40 = vpop.f32.mrb[6].mxu0 }
 0x108   : > { %v421_v39 = vmax.f32 %v394_v37, 0.0  ;;  %v607_v41 = vpop.f32.mrb[6].mxu1  ;;  %431 = vst [vmem:[%s812_s19 + $0x30] sm:$0xff] %v415_v34  ;;  %v416_v42 = vmax.f32 %v599_v40, 0.0  ;;  %v365_v44 = vpop.f32.mrb[7].mxu0 }
 0x109   : > { %439 = vst [vmem:[%s812_s19 + $0x70] sm:$0xff] %v423_v35  ;;  %v424_v43 = vmax.f32 %v607_v41, 0.0  ;;  %v397_v45 = vpop.f32.mrb[7].mxu1  ;;  %429 = vst [vmem:[%s812_s19 + $0x20] sm:$0xff] %v413_v38  ;;  %v414_v46 = vmax.f32 %v365_v44, 0.0 }
 0x10a   : > { %437 = vst [vmem:[%s812_s19 + $0x60] sm:$0xff] %v421_v39  ;;  %v422_v47 = vmax.f32 %v397_v45, 0.0  ;;  %432 = vst [vmem:[%s812_s19 + $0x38] sm:$0xff] %v416_v42 }
 0x10b   : > { %440 = vst [vmem:[%s812_s19 + $0x78] sm:$0xff] %v424_v43  ;;  %430 = vst [vmem:[%s812_s19 + $0x28] sm:$0xff] %v414_v46 }
 0x10c   : > { %438 = vst [vmem:[%s812_s19 + $0x68] sm:$0xff] %v422_v47 }
 0x10d PF: > { %s12_s13 = sadd.s32 1, %s718_s13   ;;  %s848_s9 = smov %s710_s11 }
 0x10e   : > { %p9_p7 = scmp.ge.s32.totalorder %s12_s13, 6   ;;  %s849_s10 = smov %s714_s12 }
 0x10f   : > { %s850_s11 = smov %s853_s14  ;;  %s851_s12 = smov %s857_s15 }
 0x110   :  { %11 = sbr.rel (!%p9_p7) target bundleno = 3 (0x3), region = 58 }

</bundles_post_ra>
